<compile_context>
chip_gen: v6e
topology: v6e:2x2x1
jax: 0.10.0
libtpu: 0.0.40
codegen_flags: <defaults>
</compile_context>

<pallas_src>
import functools
import math

import jax
import jax.numpy as jnp
from jax.experimental import pallas as pl
from jax.experimental.pallas import tpu as pltpu


def _apply_activation(z, activation):
    if activation == "relu":
        return jnp.maximum(z, 0.0)
    if activation == "tanh":
        return jnp.tanh(z)
    if activation == "id":
        return z
    raise ValueError("Invalid activation!")


def _round_up(v, m):
    return ((v + m - 1) // m) * m


def _deepsets_fused_kernel(x_ref, *args, n_layers, activation, lane_dense_out):
    """Run all DeepSets layers for a block of TB sets kept resident in VMEM."""
    o_ref = args[-1]
    param_refs = args[:-1]                      # (W0, b0, W1, b1, ...)
    assert len(param_refs) == 2 * n_layers

    tb, n_set, d0 = x_ref.shape
    rows = tb * n_set

    # Activations live as (rows, D) 2-D values; the reshapes below only split
    # or merge leading (non-lane) dims, so they stay cheap.
    h = x_ref[...].reshape(rows, d0)
    compute_dtype = h.dtype                     # bf16 stays bf16 on the MXU

    for layer in range(n_layers):
        w = param_refs[2 * layer][...]          # (2*D_in, D_out) = [Wc; Wa]
        b = param_refs[2 * layer + 1][...]      # (1, D_out)
        d_in = w.shape[0] // 2
        d_out = w.shape[1]

        if 2 * d_in <= 128:
            # Small K: MXU K pads to 128 anyway, so fold both linears into ONE
            # matmul:  [h | broadcast(sum_N h)] @ [[Wc],[Wa]].
            s = jnp.sum(h.reshape(tb, n_set, d_in), axis=1, keepdims=True,
                        dtype=jnp.float32)                    # (tb, 1, D_in) f32
            # d_in <= 64 here, so casting the sum back to the compute dtype
            # costs little precision even for bf16 inputs.
            s_b = jnp.broadcast_to(s.astype(compute_dtype),
                                   (tb, n_set, d_in)).reshape(rows, d_in)
            h_aug = jnp.concatenate([h, s_b], axis=-1)        # (rows, 2*D_in)
            z = jnp.dot(h_aug, w, preferred_element_type=jnp.float32)
        else:
            # Large K: split.  Per-element matmul uses all rows; the aggregate
            # matmul only has TB rows, so it is nearly free and runs in f32
            # (keeps the f32 set-sum precision for bf16 inputs).
            wc = w[:d_in, :]
            wa = w[d_in:, :]
            z = jnp.dot(h, wc, preferred_element_type=jnp.float32)  # (rows, D_out)
            s = jnp.sum(h.reshape(tb, n_set, d_in), axis=1,
                        dtype=jnp.float32)                          # (tb, D_in)
            z_all = jnp.dot(s, wa.astype(jnp.float32),
                            preferred_element_type=jnp.float32)     # (tb, D_out)
            z = (z.reshape(tb, n_set, d_out) + z_all[:, None, :]
                 ).reshape(rows, d_out)

        z = z + b.astype(jnp.float32)                # bias broadcast, f32
        z = _apply_activation(z, activation)         # f32 elementwise epilogue
        h = z.astype(compute_dtype)

    d_last = h.shape[1]
    if lane_dense_out:
        # Narrow D_out: present a lane-dense (TB, N*D_out) slab so the output
        # write is unmasked instead of D_out-of-128-lane masked stores.
        h3 = h.reshape(tb, n_set, d_last)
        o_ref[...] = jnp.concatenate(
            [h3[:, i, :] for i in range(n_set)], axis=-1).astype(o_ref.dtype)
    else:
        o_ref[...] = h.reshape(tb, n_set, d_last).astype(o_ref.dtype)


def _vmem_capacity_bytes():
    try:
        return int(pltpu.get_tpu_info().vmem_capacity_bytes)
    except Exception:
        return 64 * 1024 * 1024          # conservative fallback (v7x per-TC)


def _estimate_vmem_bytes(tb, N, D_in, D_out, layer_dims, itemsize,
                         lane_dense_out):
    """Rough VMEM footprint: double-buffered I/O blocks + weights + live values."""
    rows = tb * N

    def blk3(bb, sub, lane, isz):
        return bb * _round_up(sub, 8) * _round_up(lane, 128) * isz

    total = 2 * blk3(tb, N, D_in, itemsize)                      # input block x2
    if lane_dense_out:
        total += 2 * _round_up(tb, 8) * _round_up(N * D_out, 128) * itemsize
    else:
        total += 2 * blk3(tb, N, D_out, itemsize)                # output block x2
    for (two_d_in, d_out) in layer_dims:
        total += 2 * _round_up(two_d_in, 8) * _round_up(d_out, 128) * itemsize
        total += 2 * 8 * _round_up(d_out, 128) * itemsize        # bias
    d_max = max([D_in] + [d for (_, d) in layer_dims])
    # live intermediates per row: h (native dtype) + z (f32) + fused concat slack
    per_row = _round_up(d_max, 128) * (itemsize + 4) + 128 * itemsize
    total += rows * per_row
    return int(total * 1.3)                                      # relayout/vreg slack


def _choose_batch_tile(B, N, D_in, D_out, layer_dims, itemsize,
                       lane_dense_out, cap):
    """Sets per grid step: target 1024-4096 rows, bounded by a VMEM budget."""
    budget = int(0.6 * cap)          # v7x (64 MiB) -> ~38 MiB; v5e/v6e -> ~77 MiB
    # TB multiple of 8 (sublane) and rows = TB*N a multiple of 256 (MXU M fill).
    g = 256 // math.gcd(N, 256)
    unit = (g * 8) // math.gcd(g, 8)            # lcm(g, 8)
    target_rows = 2048
    tb = _round_up(max(1, -(-target_rows // N)), unit)
    tb = min(tb, B)
    while tb > 1 and _estimate_vmem_bytes(
            tb, N, D_in, D_out, layer_dims, itemsize, lane_dense_out) > budget:
        tb = tb - unit if tb > unit else max(1, tb // 2)
    # NOTE: no forced multi-step shrink -- on 1-TC chips (v5e/v6e) it only adds
    # per-step overhead; on v7x the natural grid from the row target already
    # gives >=2 steps for realistic batch sizes.
    return max(1, int(tb))


def deepsets_forward(x, params, activation, *, batch_tile=None):
    """Fused DeepSets forward.  x: [B, N, D_in] -> [B, N, D_out]."""
    B, N, D_in = x.shape
    n_layers = len(params)
    D_out = params[-1][0].shape[1]
    itemsize = jnp.dtype(x.dtype).itemsize
    layer_dims = [(2 * w.shape[0], w.shape[1]) for (w, _, _) in params]

    # Lane-dense output only when D_out is narrow and N*D_out is 128-aligned.
    lane_dense_out = (D_out < 128) and ((N * D_out) % 128 == 0) and (N <= 16)
    # TODO(synk): a lane-dense *input* path (x as [B, N*D_in]) needs a minor-dim
    # splitting relayout inside the kernel; left as-is (masked input loads).

    cap = _vmem_capacity_bytes()
    if batch_tile is None:
        tb = _choose_batch_tile(B, N, D_in, D_out, layer_dims, itemsize,
                                lane_dense_out, cap)
    else:
        tb = max(1, min(int(batch_tile), B))
    grid = (pl.cdiv(B, tb),)

    # Per layer, stack Wc on top of Wa (kernel slices them apart when it splits
    # the matmul).  Cast to x.dtype so bf16 inputs get bf16 MXU passes.
    flat_params = []
    for (w_curr, b_curr, w_all) in params:
        flat_params.append(
            jnp.concatenate([w_curr, w_all], axis=0).astype(x.dtype))
        flat_params.append(b_curr.reshape(1, -1).astype(x.dtype))

    in_specs = [pl.BlockSpec((tb, N, D_in), lambda b: (b, 0, 0))]
    for p in flat_params:
        # Weights/biases are small: full block, same index every step
        # (stay resident in VMEM across the whole grid).
        in_specs.append(pl.BlockSpec(p.shape, lambda b: (0, 0)))

    if lane_dense_out:
        out_shape = jax.ShapeDtypeStruct((B, N * D_out), x.dtype)
        out_spec = pl.BlockSpec((tb, N * D_out), lambda b: (b, 0))
    else:
        out_shape = jax.ShapeDtypeStruct((B, N, D_out), x.dtype)
        out_spec = pl.BlockSpec((tb, N, D_out), lambda b: (b, 0, 0))

    kernel = functools.partial(
        _deepsets_fused_kernel, n_layers=n_layers, activation=activation,
        lane_dense_out=lane_dense_out)

    vmem_limit = int(min(0.75 * cap, cap - (4 << 20)))
    out = pl.pallas_call(
        kernel,
        out_shape=out_shape,
        grid_spec=pltpu.PrefetchScalarGridSpec(
            num_scalar_prefetch=0,
            grid=grid,
            in_specs=in_specs,
            out_specs=out_spec,
        ),
        compiler_params=pltpu.CompilerParams(
            dimension_semantics=("parallel",),
            vmem_limit_bytes=vmem_limit),
    )(x, *flat_params)

    if lane_dense_out:
        out = out.reshape(B, N, D_out)
    return out


def init_deepsets_params(key, n_layers, in_dims, hidden_dims, out_dims):
    """Deterministic params matching DeepSets.__init__ shapes.

    Each layer: w_curr [D_in, D_out], b_curr [D_out], w_all [D_in, D_out]
    (PyTorch Linear weight [out, in] pre-transposed to [in, out]).
    """
    dims = []
    d = in_dims
    for _ in range(n_layers - 1):
        dims.append((d, hidden_dims))
        d = hidden_dims
    dims.append((hidden_dims, out_dims))

    params = []
    for (di, do) in dims:
        key, k1, k2, k3 = jax.random.split(key, 4)
        bound = 1.0 / jnp.sqrt(di)
        w_curr = jax.random.uniform(k1, (di, do), jnp.float32, -bound, bound)
        b_curr = jax.random.uniform(k2, (do,), jnp.float32, -bound, bound)
        w_all = jax.random.uniform(k3, (di, do), jnp.float32, -bound, bound)
        params.append((w_curr, b_curr, w_all))
    return params


def deepsets_forward_ref(x, params, activation):
    """Pure-JAX reference for correctness checking."""
    act = {"relu": lambda v: jnp.maximum(v, 0.0),
           "tanh": jnp.tanh,
           "id": lambda v: v}[activation]
    for (w_curr, b_curr, w_all) in params:
        z_curr = x @ w_curr + b_curr
        z_all = jnp.sum(x, axis=1, keepdims=True) @ w_all
        x = act(z_curr + z_all)
    return x


if __name__ == "__main__":
    key = jax.random.PRNGKey(0)
    key, xk1, pk1, xk2, pk2 = jax.random.split(key, 5)

    # Config 1: small dims -> fused-matmul path + lane-dense narrow output.
    B, N = 2, 8
    in_dims, hidden_dims, out_dims, n_layers = 16, 32, 32, 3
    x = jax.random.normal(xk1, (B, N, in_dims), dtype=jnp.float32)
    params = init_deepsets_params(pk1, n_layers, in_dims, hidden_dims, out_dims)
    for activation in ("relu", "tanh", "id"):
        out = jax.block_until_ready(deepsets_forward(x, params, activation))
        ref = deepsets_forward_ref(x, params, activation)
        assert out.shape == (B, N, out_dims)
        assert jnp.allclose(out, ref, atol=1e-3, rtol=1e-3), (
            f"mismatch vs reference for activation={activation}")

    # Config 2: wider dims -> split-matmul path + lane-aligned (128) output.
    B2, N2 = 4, 8
    in2, hid2, out2, nl2 = 64, 128, 128, 2
    x2 = jax.random.normal(xk2, (B2, N2, in2), dtype=jnp.float32)
    params2 = init_deepsets_params(pk2, nl2, in2, hid2, out2)
    out_b = jax.block_until_ready(deepsets_forward(x2, params2, "relu"))
    ref_b = deepsets_forward_ref(x2, params2, "relu")
    assert out_b.shape == (B2, N2, out2)
    assert jnp.allclose(out_b, ref_b, atol=1e-3, rtol=1e-3), (
        "mismatch vs reference for wide config")

    print("KERNEL_OK")
</pallas_src>

<mosaic_0001>
module attributes {stable_mosaic.version = 11 : i64} {
  func.func @_deepsets_fused_kernel(%arg0: i32, %arg1: memref<2x8x16xf32, #tpu.memory_space<vmem>>, %arg2: memref<32x32xf32, #tpu.memory_space<vmem>>, %arg3: memref<1x32xf32, #tpu.memory_space<vmem>>, %arg4: memref<64x32xf32, #tpu.memory_space<vmem>>, %arg5: memref<1x32xf32, #tpu.memory_space<vmem>>, %arg6: memref<64x32xf32, #tpu.memory_space<vmem>>, %arg7: memref<1x32xf32, #tpu.memory_space<vmem>>, %arg8: memref<2x256xf32, #tpu.memory_space<vmem>>) attributes {dimension_semantics = [#tpu.dimension_semantics<parallel>], iteration_bounds = array<i64: 1>, scalar_prefetch = 0 : i64, scratch_operands = 0 : i64, tpu.core_type = #tpu.core_type<tc>, window_params = [{transform_indices = @transform_0, window_bounds = array<i64: 2, 8, 16>}, {pipeline_mode = #tpu.pipeline_mode<synchronous>, transform_indices = @transform_1, window_bounds = array<i64: 32, 32>}, {pipeline_mode = #tpu.pipeline_mode<synchronous>, transform_indices = @transform_2, window_bounds = array<i64: 1, 32>}, {pipeline_mode = #tpu.pipeline_mode<synchronous>, transform_indices = @transform_3, window_bounds = array<i64: 64, 32>}, {pipeline_mode = #tpu.pipeline_mode<synchronous>, transform_indices = @transform_4, window_bounds = array<i64: 1, 32>}, {pipeline_mode = #tpu.pipeline_mode<synchronous>, transform_indices = @transform_5, window_bounds = array<i64: 64, 32>}, {pipeline_mode = #tpu.pipeline_mode<synchronous>, transform_indices = @transform_6, window_bounds = array<i64: 1, 32>}, {transform_indices = @transform_7, window_bounds = array<i64: 2, 256>}]} {
    %c0 = arith.constant 0 : index
    %c0_0 = arith.constant 0 : index
    %c0_1 = arith.constant 0 : index
    %0 = vector.load %arg1[%c0, %c0_0, %c0_1] : memref<2x8x16xf32, #tpu.memory_space<vmem>>, vector<2x8x16xf32>
    %1 = vector.shape_cast %0 : vector<2x8x16xf32> to vector<16x16xf32>
    %c0_2 = arith.constant 0 : index
    %c0_3 = arith.constant 0 : index
    %2 = vector.load %arg2[%c0_2, %c0_3] : memref<32x32xf32, #tpu.memory_space<vmem>>, vector<32x32xf32>
    %c0_4 = arith.constant 0 : index
    %c0_5 = arith.constant 0 : index
    %3 = vector.load %arg3[%c0_4, %c0_5] : memref<1x32xf32, #tpu.memory_space<vmem>>, vector<1x32xf32>
    %4 = vector.shape_cast %1 : vector<16x16xf32> to vector<2x8x16xf32>
    %cst = arith.constant dense<0.000000e+00> : vector<2x16xf32>
    %5 = vector.multi_reduction <add>, %4, %cst [1] : vector<2x8x16xf32> to vector<2x16xf32>
    %6 = vector.shape_cast %5 : vector<2x16xf32> to vector<2x1x16xf32>
    %7 = vector.shape_cast %6 : vector<2x1x16xf32> to vector<2x1x16xf32>
    %8 = vector.broadcast %7 : vector<2x1x16xf32> to vector<2x8x16xf32>
    %9 = vector.shape_cast %8 : vector<2x8x16xf32> to vector<16x16xf32>
    %10 = tpu.concatenate %1, %9 in 1 : vector<16x16xf32>, vector<16x16xf32> -> vector<16x32xf32>
    %cst_6 = arith.constant dense<0.000000e+00> : vector<16x32xf32>
    %11 = tpu.matmul %10, %2, %cst_6 {dimension_numbers = #tpu.dot_dimension_numbers<[1], [0], [0], [1], [0, 0, 1, 1], [], []>} : vector<16x32xf32>, vector<32x32xf32>, vector<16x32xf32> -> vector<16x32xf32>
    %12 = vector.broadcast %3 : vector<1x32xf32> to vector<16x32xf32>
    %13 = arith.addf %11, %12 : vector<16x32xf32>
    %cst_7 = arith.constant 0.000000e+00 : f32
    %14 = vector.broadcast %cst_7 : f32 to vector<16x32xf32>
    %15 = arith.maximumf %13, %14 : vector<16x32xf32>
    %c0_8 = arith.constant 0 : index
    %c0_9 = arith.constant 0 : index
    %16 = vector.load %arg4[%c0_8, %c0_9] : memref<64x32xf32, #tpu.memory_space<vmem>>, vector<64x32xf32>
    %c0_10 = arith.constant 0 : index
    %c0_11 = arith.constant 0 : index
    %17 = vector.load %arg5[%c0_10, %c0_11] : memref<1x32xf32, #tpu.memory_space<vmem>>, vector<1x32xf32>
    %18 = vector.shape_cast %15 : vector<16x32xf32> to vector<2x8x32xf32>
    %cst_12 = arith.constant dense<0.000000e+00> : vector<2x32xf32>
    %19 = vector.multi_reduction <add>, %18, %cst_12 [1] : vector<2x8x32xf32> to vector<2x32xf32>
    %20 = vector.shape_cast %19 : vector<2x32xf32> to vector<2x1x32xf32>
    %21 = vector.shape_cast %20 : vector<2x1x32xf32> to vector<2x1x32xf32>
    %22 = vector.broadcast %21 : vector<2x1x32xf32> to vector<2x8x32xf32>
    %23 = vector.shape_cast %22 : vector<2x8x32xf32> to vector<16x32xf32>
    %24 = tpu.concatenate %15, %23 in 1 : vector<16x32xf32>, vector<16x32xf32> -> vector<16x64xf32>
    %cst_13 = arith.constant dense<0.000000e+00> : vector<16x32xf32>
    %25 = tpu.matmul %24, %16, %cst_13 {dimension_numbers = #tpu.dot_dimension_numbers<[1], [0], [0], [1], [0, 0, 1, 1], [], []>} : vector<16x64xf32>, vector<64x32xf32>, vector<16x32xf32> -> vector<16x32xf32>
    %26 = vector.broadcast %17 : vector<1x32xf32> to vector<16x32xf32>
    %27 = arith.addf %25, %26 : vector<16x32xf32>
    %cst_14 = arith.constant 0.000000e+00 : f32
    %28 = vector.broadcast %cst_14 : f32 to vector<16x32xf32>
    %29 = arith.maximumf %27, %28 : vector<16x32xf32>
    %c0_15 = arith.constant 0 : index
    %c0_16 = arith.constant 0 : index
    %30 = vector.load %arg6[%c0_15, %c0_16] : memref<64x32xf32, #tpu.memory_space<vmem>>, vector<64x32xf32>
    %c0_17 = arith.constant 0 : index
    %c0_18 = arith.constant 0 : index
    %31 = vector.load %arg7[%c0_17, %c0_18] : memref<1x32xf32, #tpu.memory_space<vmem>>, vector<1x32xf32>
    %32 = vector.shape_cast %29 : vector<16x32xf32> to vector<2x8x32xf32>
    %cst_19 = arith.constant dense<0.000000e+00> : vector<2x32xf32>
    %33 = vector.multi_reduction <add>, %32, %cst_19 [1] : vector<2x8x32xf32> to vector<2x32xf32>
    %34 = vector.shape_cast %33 : vector<2x32xf32> to vector<2x1x32xf32>
    %35 = vector.shape_cast %34 : vector<2x1x32xf32> to vector<2x1x32xf32>
    %36 = vector.broadcast %35 : vector<2x1x32xf32> to vector<2x8x32xf32>
    %37 = vector.shape_cast %36 : vector<2x8x32xf32> to vector<16x32xf32>
    %38 = tpu.concatenate %29, %37 in 1 : vector<16x32xf32>, vector<16x32xf32> -> vector<16x64xf32>
    %cst_20 = arith.constant dense<0.000000e+00> : vector<16x32xf32>
    %39 = tpu.matmul %38, %30, %cst_20 {dimension_numbers = #tpu.dot_dimension_numbers<[1], [0], [0], [1], [0, 0, 1, 1], [], []>} : vector<16x64xf32>, vector<64x32xf32>, vector<16x32xf32> -> vector<16x32xf32>
    %40 = vector.broadcast %31 : vector<1x32xf32> to vector<16x32xf32>
    %41 = arith.addf %39, %40 : vector<16x32xf32>
    %cst_21 = arith.constant 0.000000e+00 : f32
    %42 = vector.broadcast %cst_21 : f32 to vector<16x32xf32>
    %43 = arith.maximumf %41, %42 : vector<16x32xf32>
    %44 = vector.shape_cast %43 : vector<16x32xf32> to vector<2x8x32xf32>
    %45 = vector.extract_strided_slice %44 {offsets = [0, 0, 0], sizes = [2, 1, 32], strides = [1, 1, 1]} : vector<2x8x32xf32> to vector<2x1x32xf32>
    %46 = vector.shape_cast %45 : vector<2x1x32xf32> to vector<2x32xf32>
    %47 = vector.extract_strided_slice %44 {offsets = [0, 1, 0], sizes = [2, 1, 32], strides = [1, 1, 1]} : vector<2x8x32xf32> to vector<2x1x32xf32>
    %48 = vector.shape_cast %47 : vector<2x1x32xf32> to vector<2x32xf32>
    %49 = vector.extract_strided_slice %44 {offsets = [0, 2, 0], sizes = [2, 1, 32], strides = [1, 1, 1]} : vector<2x8x32xf32> to vector<2x1x32xf32>
    %50 = vector.shape_cast %49 : vector<2x1x32xf32> to vector<2x32xf32>
    %51 = vector.extract_strided_slice %44 {offsets = [0, 3, 0], sizes = [2, 1, 32], strides = [1, 1, 1]} : vector<2x8x32xf32> to vector<2x1x32xf32>
    %52 = vector.shape_cast %51 : vector<2x1x32xf32> to vector<2x32xf32>
    %53 = vector.extract_strided_slice %44 {offsets = [0, 4, 0], sizes = [2, 1, 32], strides = [1, 1, 1]} : vector<2x8x32xf32> to vector<2x1x32xf32>
    %54 = vector.shape_cast %53 : vector<2x1x32xf32> to vector<2x32xf32>
    %55 = vector.extract_strided_slice %44 {offsets = [0, 5, 0], sizes = [2, 1, 32], strides = [1, 1, 1]} : vector<2x8x32xf32> to vector<2x1x32xf32>
    %56 = vector.shape_cast %55 : vector<2x1x32xf32> to vector<2x32xf32>
    %57 = vector.extract_strided_slice %44 {offsets = [0, 6, 0], sizes = [2, 1, 32], strides = [1, 1, 1]} : vector<2x8x32xf32> to vector<2x1x32xf32>
    %58 = vector.shape_cast %57 : vector<2x1x32xf32> to vector<2x32xf32>
    %59 = vector.extract_strided_slice %44 {offsets = [0, 7, 0], sizes = [2, 1, 32], strides = [1, 1, 1]} : vector<2x8x32xf32> to vector<2x1x32xf32>
    %60 = vector.shape_cast %59 : vector<2x1x32xf32> to vector<2x32xf32>
    %61 = tpu.concatenate %46, %48, %50, %52, %54, %56, %58, %60 in 1 : vector<2x32xf32>, vector<2x32xf32>, vector<2x32xf32>, vector<2x32xf32>, vector<2x32xf32>, vector<2x32xf32>, vector<2x32xf32>, vector<2x32xf32> -> vector<2x256xf32>
    %c0_22 = arith.constant 0 : index
    %c0_23 = arith.constant 0 : index
    %62 = vector.load %arg8[%c0_22, %c0_23] : memref<2x256xf32, #tpu.memory_space<vmem>>, vector<2x256xf32>
    tpu.vector_store %arg8[%c0_22, %c0_23], %61 {strides = array<i32>} : memref<2x256xf32, #tpu.memory_space<vmem>>, vector<2x256xf32>,
    return
  }
  func.func @transform_0(%arg0: i32) -> (i32, i32, i32) {
    %c0_i32 = arith.constant 0 : i32
    %c0_i32_0 = arith.constant 0 : i32
    %c0_i32_1 = arith.constant 0 : i32
    return %arg0, %c0_i32, %c0_i32_0 : i32, i32, i32
  }
  func.func @transform_1(%arg0: i32) -> (i32, i32) {
    %c0_i32 = arith.constant 0 : i32
    %c0_i32_0 = arith.constant 0 : i32
    %c0_i32_1 = arith.constant 0 : i32
    return %c0_i32, %c0_i32_0 : i32, i32
  }
  func.func @transform_2(%arg0: i32) -> (i32, i32) {
    %c0_i32 = arith.constant 0 : i32
    %c0_i32_0 = arith.constant 0 : i32
    %c0_i32_1 = arith.constant 0 : i32
    return %c0_i32, %c0_i32_0 : i32, i32
  }
  func.func @transform_3(%arg0: i32) -> (i32, i32) {
    %c0_i32 = arith.constant 0 : i32
    %c0_i32_0 = arith.constant 0 : i32
    %c0_i32_1 = arith.constant 0 : i32
    return %c0_i32, %c0_i32_0 : i32, i32
  }
  func.func @transform_4(%arg0: i32) -> (i32, i32) {
    %c0_i32 = arith.constant 0 : i32
    %c0_i32_0 = arith.constant 0 : i32
    %c0_i32_1 = arith.constant 0 : i32
    return %c0_i32, %c0_i32_0 : i32, i32
  }
  func.func @transform_5(%arg0: i32) -> (i32, i32) {
    %c0_i32 = arith.constant 0 : i32
    %c0_i32_0 = arith.constant 0 : i32
    %c0_i32_1 = arith.constant 0 : i32
    return %c0_i32, %c0_i32_0 : i32, i32
  }
  func.func @transform_6(%arg0: i32) -> (i32, i32) {
    %c0_i32 = arith.constant 0 : i32
    %c0_i32_0 = arith.constant 0 : i32
    %c0_i32_1 = arith.constant 0 : i32
    return %c0_i32, %c0_i32_0 : i32, i32
  }
  func.func @transform_7(%arg0: i32) -> (i32, i32) {
    %c0_i32 = arith.constant 0 : i32
    %c0_i32_0 = arith.constant 0 : i32
    return %arg0, %c0_i32 : i32, i32
  }
}

</mosaic_0001>

<bundles_post_ra>
// kernel: tpu_custom_call.1
= control target key start
LH: loop header
LB: loop body
LE: loop exit
PB: predicated region body
PF: predicated region fallthrough
CT: control target
= control target key end

     0   :  { %vm34_vm0 = vcmask 130048   ;;  %s743_s0 = inlined_call_operand.vmem [shape: f32[2,8,16], index: 0, kind: input, shape index: {}]   ;;  %s744_s1 = inlined_call_operand.vmem [shape: f32[32,32], index: 1, kind: input, shape index: {}]   ;;  %s745_s2 = inlined_call_operand.vmem [shape: f32[1,32], index: 2, kind: input, shape index: {}]   ;;  %s746_s3 = inlined_call_operand.vmem [shape: f32[64,32], index: 3, kind: input, shape index: {}]   ;;  %s747_s4 = inlined_call_operand.vmem [shape: f32[1,32], index: 4, kind: input, shape index: {}]   ;;  %s748_s5 = inlined_call_operand.vmem [shape: f32[64,32], index: 5, kind: input, shape index: {}]   ;;  %s749_s6 = inlined_call_operand.vmem [shape: f32[1,32], index: 6, kind: input, shape index: {}]   ;;  %s750_s7 = inlined_call_operand.hbm [shape: f32[2,256], index: 7, kind: output, shape index: {}]  }
   0x1   :  { %v27_v0 = vld [vmem:[%s743_s0] sm:$0xff]  ;;  %v28_v1 = vld [vmem:[%s743_s0 + $0x8] sm:$0xff]  ;;  %v32_v2 = vld [vmem:[%s744_s1 + $0x18] sm:$0xff] }
   0x2   :  { %v35_v3 = vsel %vm34_vm0, %v27_v0, 0.0  ;;  %v42_v4 = vsel %vm34_vm0, %v28_v1, 0.0  ;;  %508 = vmatprep.subr.mxu0 %v32_v2  ;;  %v31_v5 = vld [vmem:[%s744_s1 + $0x10] sm:$0xff]  ;;  %v30_v8 = vld [vmem:[%s744_s1 + $0x8] sm:$0xff] }
   0x3   :  { %v36_v6 = vrot.slane %v35_v3, 4  ;;  %v43_v7 = vrot.slane %v42_v4, 4  ;;  %509 = vmatpush3.msra.mxu0 %v32_v2 }
   0x4   :  { %12 = vsyncpa [#allocation3], 0  ;;  %510 = vmatprep.subr.mxu0 %v31_v5  ;;  %v29_v11 = vld [vmem:[%s744_s1] sm:$0xff]  ;;  %s584_s12 = smov 16   ;;  %vm65_vm1 = vcmask 261120   ;;  %v156_v24 = vld [vmem:[%s746_s3 + $0x38] sm:$0xff] }
   0x5   :  { %v37_v9 = vadd.f32 %v36_v6, %v35_v3  ;;  %v44_v10 = vadd.f32 %v43_v7, %v42_v4  ;;  %511 = vmatpush3.msra.mxu0 %v31_v5  ;;  %v155_v25 = vld [vmem:[%s746_s3 + $0x30] sm:$0xff]  ;;  %519 = vmatprep.subr.mxu1 %v156_v24  ;;  %v154_v26 = vld [vmem:[%s746_s3 + $0x28] sm:$0xff]  ;;  %v153_v27 = vld [vmem:[%s746_s3 + $0x20] sm:$0xff]  ;;  %s585_s29 = smov 32   ;;  %vm188_vm2 = vcmask 523264   ;;  %vm397_vm3 = vcmask 1041409  }
   0x6   :  { %512 = vmatprep.subr.mxu0 %v30_v8  ;;  %520 = vmatpush3.msra.mxu1 %v156_v24  ;;  %v152_v28 = vld [vmem:[%s746_s3 + $0x18] sm:$0xff]  ;;  %v151_v29 = vld [vmem:[%s746_s3 + $0x10] sm:$0xff]  ;;  %v472_v30 = vld [vmem:[%s745_s2] ss:$0 sm:$0xff]  ;;  %s587_s22 = smov 96   ;;  %vm441_vm4 = vcmask 785408  }
   0x7   :  { %v38_v12 = vrot.slane %v37_v9, 2  ;;  %v45_v13 = vrot.slane %v44_v10, 2  ;;  %513 = vmatpush3.msra.mxu0 %v30_v8  ;;  %521 = vmatprep.subr.mxu1 %v155_v25  ;;  %v150_v39 = vld [vmem:[%s746_s3 + $0x8] sm:$0xff]  ;;  %v149_v43 = vld [vmem:[%s746_s3] sm:$0xff]  ;;  %v279_v57 = vld [vmem:[%s748_s5 + $0x38] sm:$0xff]  ;;  %s588_s23 = smov [#allocation2]  }
   0x8   :  { %514 = vmatprep.subr.mxu0 %v29_v11  ;;  %522 = vmatpush3.msra.mxu1 %v155_v25  ;;  %v278_v58 = vld [vmem:[%s748_s5 + $0x30] sm:$0xff]  ;;  %v277_v59 = vld [vmem:[%s748_s5 + $0x28] sm:$0xff]  ;;  %v276_v60 = vld [vmem:[%s748_s5 + $0x20] sm:$0xff]  ;;  %s464_s24 = sshll.u32 %s588_s23, 4  ;;  %s465_s24 = int_to_ptr.vmem [resolvable:$true] %s464_s24 }
   0x9   :  { %v39_v14 = vadd.f32 %v38_v12, %v37_v9  ;;  %v46_v15 = vadd.f32 %v45_v13, %v44_v10  ;;  %515 = vmatpush3.msra.mxu0 %v29_v11  ;;  %523 = vmatprep.subr.mxu1 %v154_v26  ;;  %v275_v61 = vld [vmem:[%s748_s5 + $0x18] sm:$0xff]  ;;  %v274_v62 = vld [vmem:[%s748_s5 + $0x10] sm:$0xff]  ;;  %v475_v63 = vld [vmem:[%s747_s4] ss:$0 sm:$0xff]  ;;  %s562_s25 = scalar_lea.vmem %s465_s24, 64  ;;  %p567_p1 = scmp.lt.s32.totalorder %s465_s24, %s465_s24 }
   0xa   :  { %524 = vmatpush3.msra.mxu1 %v154_v26  ;;  %538 = vmatprep.subr.mxu0 %v279_v57  ;;  %v273_v5 = vld [vmem:[%s748_s5 + $0x8] sm:$0xff]  ;;  %v272_v9 = vld [vmem:[%s748_s5] sm:$0xff]  ;;  %p563_p0 = scmp.ne.s32.totalorder %s465_s24, %s562_s25  ;;  %p568_p2 = scmp.lt.s32.totalorder %s562_s25, %s562_s25 }
   0xb   :  { %v40_v16 = vrot.slane %v39_v14, 1  ;;  %v47_v17 = vrot.slane %v46_v15, 1  ;;  %525 = vmatprep.subr.mxu1 %v153_v27  ;;  %v478_v26 = vld [vmem:[%s749_s6] ss:$0 sm:$0xff]  ;;  %s586_s6 = smov 64  }
   0xc   :  { %526 = vmatpush3.msra.mxu1 %v153_v27  ;;  %p569_p3 = por %p568_p2, %p567_p1 }
   0xd   :  { %v41_v18 = vadd.f32 %v40_v16, %v39_v14  ;;  %v48_v19 = vadd.f32 %v47_v17, %v46_v15  ;;  %527 = vmatprep.subr.mxu1 %v152_v28 }
   0xe   :  { %528 = vmatpush3.msra.mxu1 %v152_v28  ;;  %p570_p4 = pnand %p569_p3, %p563_p0 }
   0xf   :  { %51 = vrot.lane.b32.xlu0 %v41_v18, %s584_s12  ;;  %529 = vmatprep.subr.mxu1 %v151_v29 }
  0x10   :  { %530 = vmatpush3.msra.mxu1 %v151_v29 }
  0x11   :  { %531 = vmatprep.subr.mxu1 %v150_v39 }
  0x12   :  { %532 = vmatpush3.msra.mxu1 %v150_v39 }
  0x13   :  { %53 = vrot.lane.b32.xlu0 %v48_v19, %s584_s12  ;;  %533 = vmatprep.subr.mxu1 %v149_v43 }
  0x14   :  { %534 = vmatpush3.msra.mxu1 %v149_v43 }
  0x81   :  { %v52_v20 = vpop.permute.xlu0 %51 }
  0x82   :  { %v57_v21 = vsel %vm34_vm0, %v27_v0, %v52_v20 }
  0x83   :  { %516 = vmatprep.mubr.msk.f32.mxu0 %vm65_vm1, %v57_v21 }
  0x85   :  { %v54_v22 = vpop.permute.xlu0 %53 }
  0x86   :  { %v58_v23 = vsel %vm34_vm0, %v28_v1, %v54_v22 }
  0x87   :  { %517 = vmatmul.mubr.msk.f32.vlgmr.msra.gmra.mxu0 %vm65_vm1, %v58_v23 }
  0x88   :  { %539 = vmatpush3.msra.mxu0 %v279_v57 }
  0x89   :  { %540 = vmatprep.subr.mxu0 %v278_v58 }
  0x8a   :  { %541 = vmatpush3.msra.mxu0 %v278_v58 }
  0x8b   :  { %542 = vmatprep.subr.mxu0 %v277_v59 }
  0x8c   :  { %543 = vmatpush3.msra.mxu0 %v277_v59 }
  0x8d   :  { %544 = vmatprep.subr.mxu0 %v276_v60 }
  0x8e   :  { %545 = vmatpush3.msra.mxu0 %v276_v60 }
  0x8f   :  { %546 = vmatprep.subr.mxu0 %v275_v61 }
  0x90   :  { %547 = vmatpush3.msra.mxu0 %v275_v61 }
  0x91   :  { %548 = vmatprep.subr.mxu0 %v274_v62 }
  0x92   :  { %549 = vmatpush3.msra.mxu0 %v274_v62 }
  0x93   :  { %550 = vmatprep.subr.mxu0 %v273_v5 }
  0x94   :  { %551 = vmatpush3.msra.mxu0 %v273_v5 }
  0x95   :  { %552 = vmatprep.subr.mxu0 %v272_v9 }
  0x96   :  { %553 = vmatpush3.msra.mxu0 %v272_v9 }
 0x147   :  { %v518_v31 = vpop.f32.mrf.mxu0 }
 0x148   :  { %v144_v32 = vadd.f32 %v518_v31, %v472_v30 }
 0x149   :  { %v138_v33 = vpop.f32.mrf.mxu0 }
 0x14a   :  { %v148_v34 = vmax.f32 %v144_v32, 0.0  ;;  %v139_v35 = vadd.f32 %v472_v30, %v138_v33 }
 0x14c   :  { %v165_v36 = vsel %vm65_vm1, %v148_v34, 0.0  ;;  %v147_v37 = vmax.f32 %v139_v35, 0.0 }
 0x14d   :  { %v166_v38 = vrot.slane %v165_v36, 4 }
 0x14e   :  { %v158_v40 = vsel %vm65_vm1, %v147_v37, 0.0 }
 0x14f   :  { %v167_v41 = vadd.f32 %v166_v38, %v165_v36  ;;  %v159_v42 = vrot.slane %v158_v40, 4 }
 0x151   :  { %v168_v44 = vrot.slane %v167_v41, 2  ;;  %v160_v45 = vadd.f32 %v159_v42, %v158_v40 }
 0x153   :  { %v161_v46 = vrot.slane %v160_v45, 2  ;;  %v169_v48 = vadd.f32 %v168_v44, %v167_v41 }
 0x155   :  { %v162_v47 = vadd.f32 %v161_v46, %v160_v45  ;;  %v170_v51 = vrot.slane %v169_v48, 1 }
 0x157   :  { %v163_v49 = vrot.slane %v162_v47, 1  ;;  %v171_v52 = vadd.f32 %v170_v51, %v169_v48 }
 0x159   :  { %v164_v50 = vadd.f32 %v163_v49, %v162_v47 }
 0x15b   :  { %174 = vrot.lane.b32.xlu1 %v164_v50, %s585_s29 }
 0x15f   :  { %176 = vrot.lane.b32.xlu1 %v171_v52, %s585_s29 }
 0x1cd   :  { %v175_v53 = vpop.permute.xlu1 %174 }
 0x1ce   :  { %v180_v54 = vsel %vm65_vm1, %v147_v37, %v175_v53 }
 0x1cf   :  { %535 = vmatprep.mubr.msk.f32.mxu1 %vm188_vm2, %v180_v54 }
 0x1d1   :  { %v177_v55 = vpop.permute.xlu1 %176 }
 0x1d2   :  { %v181_v56 = vsel %vm65_vm1, %v148_v34, %v177_v55 }
 0x1d3   :  { %536 = vmatmul.mubr.msk.f32.vlgmr.msra.gmra.mxu1 %vm188_vm2, %v181_v56 }
 0x293   :  { %v537_v0 = vpop.f32.mrf.mxu1 }
 0x294   :  { %v267_v1 = vadd.f32 %v537_v0, %v475_v63 }
 0x295   :  { %v261_v2 = vpop.f32.mrf.mxu1 }
 0x296   :  { %v271_v3 = vmax.f32 %v267_v1, 0.0  ;;  %v262_v4 = vadd.f32 %v475_v63, %v261_v2 }
 0x298   :  { %v288_v6 = vsel %vm65_vm1, %v271_v3, 0.0  ;;  %v270_v7 = vmax.f32 %v262_v4, 0.0 }
 0x299   :  { %v289_v8 = vrot.slane %v288_v6, 4 }
 0x29a   :  { %v281_v10 = vsel %vm65_vm1, %v270_v7, 0.0 }
 0x29b   :  { %v290_v11 = vadd.f32 %v289_v8, %v288_v6  ;;  %v282_v12 = vrot.slane %v281_v10, 4 }
 0x29d   :  { %v291_v13 = vrot.slane %v290_v11, 2  ;;  %v283_v14 = vadd.f32 %v282_v12, %v281_v10 }
 0x29f   :  { %v284_v15 = vrot.slane %v283_v14, 2  ;;  %v292_v16 = vadd.f32 %v291_v13, %v290_v11 }
 0x2a1   :  { %v293_v17 = vrot.slane %v292_v16, 1  ;;  %v285_v18 = vadd.f32 %v284_v15, %v283_v14 }
 0x2a3   :  { %v294_v19 = vadd.f32 %v293_v17, %v292_v16  ;;  %v286_v20 = vrot.slane %v285_v18, 1 }
 0x2a5   :  { %299 = vrot.lane.b32.xlu1 %v294_v19, %s585_s29  ;;  %v287_v21 = vadd.f32 %v286_v20, %v285_v18 }
 0x2a7   :  { %297 = vrot.lane.b32.xlu0 %v287_v21, %s585_s29 }
 0x317   :  { %v300_v22 = vpop.permute.xlu1 %299 }
 0x318   :  { %v304_v25 = vsel %vm65_vm1, %v271_v3, %v300_v22 }
 0x319   :  { %v298_v23 = vpop.permute.xlu0 %297 }
 0x31a   :  { %v303_v24 = vsel %vm65_vm1, %v270_v7, %v298_v23 }
 0x31b   :  { %554 = vmatprep.mubr.msk.f32.mxu0 %vm188_vm2, %v303_v24 }
 0x31c   :  { %555 = vmatmul.mubr.msk.f32.vlgmr.msra.gmra.mxu0 %vm188_vm2, %v304_v25 }
 0x3dc   :  { %v556_v27 = vpop.f32.mrf.mxu0 }
 0x3dd   :  { %v389_v28 = vadd.f32 %v556_v27, %v478_v26 }
 0x3de   :  { %v383_v29 = vpop.f32.mrf.mxu0 }
 0x3df   :  { %v393_v30 = vmax.f32 %v389_v28, 0.0  ;;  %v384_v31 = vadd.f32 %v478_v26, %v383_v29 }
 0x3e1   :  { %v392_v32 = vmax.f32 %v384_v31, 0.0  ;;  %v396_v33 = vrot.slane %v393_v30, 7  ;;  %v422_v35 = vrot.slane %v393_v30, 4  ;;  %v418_v37 = vrot.slane %v393_v30, 3 }
 0x3e2   :  { %v428_v45 = vrot.slane %v393_v30, 5  ;;  %v406_v46 = vrot.slane %v393_v30, 1  ;;  %v434_v51 = vrot.slane %v393_v30, 6  ;;  %v412_v52 = vrot.slane %v393_v30, 2 }
 0x3e3   :  { %v421_v34 = vrot.slane %v392_v32, 5  ;;  %v400_v36 = vrot.slane %v392_v32, 1  ;;  %v417_v38 = vrot.slane %v392_v32, 4  ;;  %v398_v39 = vsel %vm397_vm3, %v396_v33, %v392_v32 }
 0x3e4   :  { %v427_v42 = vrot.slane %v392_v32, 6  ;;  %v405_v43 = vrot.slane %v392_v32, 2  ;;  %v433_v49 = vrot.slane %v392_v32, 7  ;;  %v411_v50 = vrot.slane %v392_v32, 3 }
 0x3e5   :  { %v423_v40 = vsel %vm397_vm3, %v422_v35, %v421_v34  ;;  %v401_v41 = vsel %vm397_vm3, %v393_v30, %v400_v36  ;;  %v419_v44 = vsel %vm397_vm3, %v418_v37, %v417_v38 }
 0x3e6   :  { %424 = vrot.lane.b32.xlu1 %v423_v40, %s585_s29  ;;  %402 = vrot.lane.b32.xlu0 %v401_v41, %s585_s29  ;;  %v429_v47 = vsel %vm397_vm3, %v428_v45, %v427_v42  ;;  %v407_v48 = vsel %vm397_vm3, %v406_v46, %v405_v43  ;;  %v435_v53 = vsel %vm397_vm3, %v434_v51, %v433_v49 }
 0x3e7   :  { %v413_v54 = vsel %vm397_vm3, %v412_v52, %v411_v50 }
 0x3ea   :  { %430 = vrot.lane.b32.xlu1 %v429_v47, %s586_s6  ;;  %408 = vrot.lane.b32.xlu0 %v407_v48, %s586_s6 }
 0x3ee   :  { %436 = vrot.lane.b32.xlu1 %v435_v53, %s587_s22  ;;  %414 = vrot.lane.b32.xlu0 %v413_v54, %s587_s22 }
 0x458   :  { %v425_v55 = vpop.permute.xlu1 %424  ;;  %v403_v56 = vpop.permute.xlu0 %402 }
 0x459   :  { %v443_v59 = vsel %vm65_vm1, %v419_v44, %v425_v55  ;;  %v439_v60 = vsel %vm65_vm1, %v398_v39, %v403_v56 }
 0x45c   :  { %v431_v57 = vpop.permute.xlu1 %430  ;;  %v409_v58 = vpop.permute.xlu0 %408 }
 0x45d   :  { %v444_v61 = vsel %vm188_vm2, %v443_v59, %v431_v57  ;;  %v440_v62 = vsel %vm188_vm2, %v439_v60, %v409_v58 }
 0x460   :  { %v437_v63 = vpop.permute.xlu1 %436  ;;  %v415_v0 = vpop.permute.xlu0 %414 }
 0x461   :  { %v445_v1 = vsel %vm441_vm4, %v444_v61, %v437_v63  ;;  %v442_v2 = vsel %vm441_vm4, %v440_v62, %v415_v0 }
 0x462   :  { %v448_v3 = vcombine.low %v442_v2, %v445_v1 }
 0x464   :  { %481 = vst.sshfl [vmem:[#allocation2] sm:$0x33 pattern:$0x76325410] %v448_v3 }
 0x465   :  { %573 = shalt.err (!%p570_p4)
}
 0x466   :  { %467 = dma.vmem_to_hbm [thread:$0]  %s465_s24, 64, %s750_s7, [#allocation3]  }
 0x467   :  { %582 = dma.done.wait [#allocation3], 64  }
 0x468   :  { %583 = vsyncadd [#allocation3], 4294967232 }
 0x469   :  { %471 = vsyncpa [#allocation3], 1 }

</bundles_post_ra>
